<compile_context>
chip_gen: v7x
topology: tpu7x:2x2x1
jax: 0.10.0
libtpu: 0.0.40
codegen_flags: <defaults>
</compile_context>

<pallas_src>
import jax
import jax.numpy as jnp
from jax.experimental import pallas as pl
from jax.experimental.pallas import tpu as pltpu

_VMEM_LIMIT = 32 * 1024 * 1024  # explicit scoped-VMEM budget (safe on v5e/v6e/v7x)


# ----------------------------------------------------------------------------
# Kernel 1: fused qkv pointwise (1x1) conv == row-tiled matmul over channels
# ----------------------------------------------------------------------------
def _pw_kernel(x_ref, w_ref, b_ref, o_ref):
    # x_ref: (TM, Cin), w_ref: (Cin, Cout), b_ref: (1, Cout), o_ref: (TM, Cout)
    acc = jnp.dot(x_ref[...], w_ref[...], preferred_element_type=jnp.float32)
    o_ref[...] = (acc + b_ref[...]).astype(o_ref.dtype)


def _row_tile(m):
    if m >= 2048:
        return 1024
    if m >= 1024:
        return 512
    # small M: split into ~2 tiles (keeps >=2 grid steps for megacore parts)
    t = (((m + 1) // 2) + 7) // 8 * 8
    return max(t, 8)


def pointwise_conv(x2d, w_oi, bias):
    """x2d: (M, Cin); w_oi: (Cout, Cin) torch layout; bias: (Cout,) -> (M, Cout)."""
    m, cin = x2d.shape
    cout = w_oi.shape[0]
    w_io = jnp.transpose(w_oi, (1, 0))            # (Cin, Cout)
    tm = _row_tile(m)
    mp = -(-m // tm) * tm
    xp = x2d if mp == m else jnp.pad(x2d, ((0, mp - m), (0, 0)))
    out = pl.pallas_call(
        _pw_kernel,
        out_shape=jax.ShapeDtypeStruct((mp, cout), x2d.dtype),
        grid=(mp // tm,),
        in_specs=[
            pl.BlockSpec((tm, cin), lambda i: (i, 0)),
            pl.BlockSpec((cin, cout), lambda i: (0, 0)),
            pl.BlockSpec((1, cout), lambda i: (0, 0)),
        ],
        out_specs=pl.BlockSpec((tm, cout), lambda i: (i, 0)),
        compiler_params=pltpu.CompilerParams(
            dimension_semantics=("parallel",),
            vmem_limit_bytes=_VMEM_LIMIT),
    )(xp, w_io, bias.reshape(1, cout))
    return out if mp == m else out[:m]


# ----------------------------------------------------------------------------
# Kernel 2: fused  [3x3 depthwise conv (q,k,v) + mask + channel attention +
#                   project_out]  -- one (batch) image per grid step
# ----------------------------------------------------------------------------
def _make_fused_kernel(num_heads, with_mask):
    def kernel(qkv_ref, wdw_ref, bdw_ref, temp_ref, wp_ref, bp_ref, *rest):
        if with_mask:
            mask_ref, o_ref, xpad_ref = rest
        else:
            o_ref, xpad_ref = rest
            mask_ref = None

        h_dim, w_dim, c3 = qkv_ref.shape[1], qkv_ref.shape[2], qkv_ref.shape[3]
        c = c3 // 3
        ch = c // num_heads
        hw = h_dim * w_dim

        # ---- 3x3 depthwise conv, padding=1, done entirely in VMEM ----------
        xpad_ref[...] = jnp.zeros_like(xpad_ref)
        xpad_ref[1:h_dim + 1, 1:w_dim + 1, :] = qkv_ref[0].astype(jnp.float32)
        xp = xpad_ref[...]                                    # (H+2, W+2, 3C)
        wts = wdw_ref[...].astype(jnp.float32)                # (3, 3, 3C)
        acc = jnp.zeros((h_dim, w_dim, c3), jnp.float32)
        for dy in range(3):
            for dx in range(3):
                acc = acc + xp[dy:dy + h_dim, dx:dx + w_dim, :] * wts[dy, dx]
        y = acc + bdw_ref[0].astype(jnp.float32)
        if mask_ref is not None:          # mask on q/k channels, ones on v
            y = y * mask_ref[0].astype(jnp.float32)

        # ---- per-head channel attention (channels-last, no transposes) -----
        qkv = y.reshape(hw, c3)
        q = qkv[:, :c]
        k = qkv[:, c:2 * c]
        v = qkv[:, 2 * c:]
        eps2 = 1e-24  # (torch F.normalize eps)**2
        qn = q * jax.lax.rsqrt(jnp.maximum(jnp.sum(q * q, axis=0, keepdims=True), eps2))
        kn = k * jax.lax.rsqrt(jnp.maximum(jnp.sum(k * k, axis=0, keepdims=True), eps2))
        qn = qn * temp_ref[0]             # fold per-head temperature into q

        wp = wp_ref[...].astype(jnp.float32)                  # (C, C) in->out
        proj = jnp.zeros((hw, c), jnp.float32) + bp_ref[...].astype(jnp.float32)
        for head in range(num_heads):
            sl = slice(head * ch, (head + 1) * ch)
            # attn[cq, ck] = sum_hw qn[hw, cq] * kn[hw, ck]
            attn = jax.lax.dot_general(
                qn[:, sl], kn[:, sl], (((0,), (0,)), ((), ())),
                preferred_element_type=jnp.float32)            # (ch, ch)
            attn = attn - jnp.max(attn, axis=-1, keepdims=True)
            e = jnp.exp(attn)
            p = e * pl.reciprocal(jnp.sum(e, axis=-1, keepdims=True), approx=True)
            # out[hw, cq] = sum_ck p[cq, ck] * v[hw, ck]
            oh = jax.lax.dot_general(
                v[:, sl], p, (((1,), (1,)), ((), ())),
                preferred_element_type=jnp.float32)            # (hw, ch)
            # project_out folded per head: accumulate oh @ Wp[sl, :]
            proj = proj + jax.lax.dot_general(
                oh, wp[sl, :], (((1,), (0,)), ((), ())),
                preferred_element_type=jnp.float32)
        o_ref[0] = proj.astype(o_ref.dtype)

    return kernel


def fused_dwconv_attention_project(qkv_nhwc, w_dw, b_dw, temp_row,
                                   w_proj_io, b_proj, num_heads, mask_nhwc3=None):
    """qkv_nhwc: (B, H, W, 3C);  returns (B, H*W, C) already projected."""
    b, h, w, c3 = qkv_nhwc.shape
    c = c3 // 3
    hw = h * w
    kernel = _make_fused_kernel(num_heads, mask_nhwc3 is not None)
    in_specs = [
        pl.BlockSpec((1, h, w, c3), lambda i: (i, 0, 0, 0)),
        pl.BlockSpec((3, 3, c3), lambda i: (0, 0, 0)),
        pl.BlockSpec((1, c3), lambda i: (0, 0)),
        pl.BlockSpec((1, c), lambda i: (0, 0)),
        pl.BlockSpec((c, c), lambda i: (0, 0)),
        pl.BlockSpec((1, c), lambda i: (0, 0)),
    ]
    args = [qkv_nhwc, w_dw, b_dw.reshape(1, c3), temp_row.reshape(1, c),
            w_proj_io, b_proj.reshape(1, c)]
    if mask_nhwc3 is not None:
        in_specs.append(pl.BlockSpec((1, h, w, c3), lambda i: (i, 0, 0, 0)))
        args.append(mask_nhwc3)
    return pl.pallas_call(
        kernel,
        out_shape=jax.ShapeDtypeStruct((b, hw, c), qkv_nhwc.dtype),
        grid=(b,),
        in_specs=in_specs,
        out_specs=pl.BlockSpec((1, hw, c), lambda i: (i, 0, 0)),
        scratch_shapes=[pltpu.VMEM((h + 2, w + 2, c3), jnp.float32)],
        compiler_params=pltpu.CompilerParams(
            dimension_semantics=("parallel",),
            vmem_limit_bytes=_VMEM_LIMIT),
    )(*args)


# ----------------------------------------------------------------------------
# Full forward (wrapper = layout glue + weight packing; compute in kernels)
# ----------------------------------------------------------------------------
def attention_forward(x_nchw, params, num_heads, mask=None):
    B, C, H, W = x_nchw.shape
    ch = C // num_heads
    xf = jnp.transpose(x_nchw, (0, 2, 3, 1)).reshape(B * H * W, C)   # channels-last

    # fused qkv weights: three (C, C) torch weights -> one (3C, C) / (3C,)
    w_qkv = jnp.concatenate(
        [params["qkv0_w"], params["qkv1_w"], params["qkv2_w"]], axis=0)
    b_qkv = jnp.concatenate(
        [params["qkv0_b"], params["qkv1_b"], params["qkv2_b"]], axis=0)
    qkv = pointwise_conv(xf, w_qkv, b_qkv).reshape(B, H, W, 3 * C)

    # fused depthwise weights: three (C, 3, 3) -> (3, 3, 3C)
    w_dw = jnp.transpose(
        jnp.concatenate([params["dw1_w"], params["dw2_w"], params["dw3_w"]], axis=0),
        (1, 2, 0))
    b_dw = jnp.concatenate([params["dw1_b"], params["dw2_b"], params["dw3_b"]], axis=0)

    mask_nhwc3 = None
    if mask is not None:  # mask supplied NCHW (broadcastable over channels) like torch
        m = jnp.transpose(mask, (0, 2, 3, 1))
        m = jnp.broadcast_to(m, (B, H, W, C)).astype(qkv.dtype)
        mask_nhwc3 = jnp.concatenate([m, m, jnp.ones_like(m)], axis=-1)

    temp_row = jnp.repeat(params["temperature"], ch)          # (C,) head-major
    w_proj_io = jnp.transpose(params["proj_w"], (1, 0))       # (Cin, Cout)

    out = fused_dwconv_attention_project(
        qkv, w_dw, b_dw, temp_row, w_proj_io, params["proj_b"],
        num_heads, mask_nhwc3)                                # (B, HW, C)
    out = out.reshape(B, H, W, C)
    return jnp.transpose(out, (0, 3, 1, 2))                   # back to NCHW


# ----------------------------------------------------------------------------
# Pure-JAX reference (XLA convs / einsum) for correctness check
# ----------------------------------------------------------------------------
def reference_forward(x, p, num_heads):
    hi = jax.lax.Precision.HIGHEST

    def conv1x1(x, w, b):
        y = jax.lax.conv_general_dilated(
            x, w.reshape(w.shape[0], w.shape[1], 1, 1), (1, 1), "VALID",
            dimension_numbers=("NCHW", "OIHW", "NCHW"), precision=hi)
        return y + b.reshape(1, -1, 1, 1)

    def dwconv(x, w, b):
        C = x.shape[1]
        y = jax.lax.conv_general_dilated(
            x, w.reshape(C, 1, 3, 3), (1, 1), "SAME",
            dimension_numbers=("NCHW", "OIHW", "NCHW"),
            feature_group_count=C, precision=hi)
        return y + b.reshape(1, -1, 1, 1)

    B, C, H, W = x.shape
    ch = C // num_heads
    q = dwconv(conv1x1(x, p["qkv0_w"], p["qkv0_b"]), p["dw1_w"], p["dw1_b"])
    k = dwconv(conv1x1(x, p["qkv1_w"], p["qkv1_b"]), p["dw2_w"], p["dw2_b"])
    v = dwconv(conv1x1(x, p["qkv2_w"], p["qkv2_b"]), p["dw3_w"], p["dw3_b"])
    qr = q.reshape(B, num_heads, ch, H * W)
    kr = k.reshape(B, num_heads, ch, H * W)
    vr = v.reshape(B, num_heads, ch, H * W)

    def l2n(a):
        return a / jnp.maximum(jnp.sqrt(jnp.sum(a * a, axis=-1, keepdims=True)), 1e-12)

    attn = jnp.einsum("bhcd,bhed->bhce", l2n(qr), l2n(kr), precision=hi)
    attn = attn * p["temperature"].reshape(1, num_heads, 1, 1)
    attn = jax.nn.softmax(attn, axis=-1)
    out = jnp.einsum("bhce,bhed->bhcd", attn, vr, precision=hi).reshape(B, C, H, W)
    return conv1x1(out, p["proj_w"], p["proj_b"])


# ----------------------------------------------------------------------------
# Deterministic parameter init (shapes per Attention.__init__; bias=True)
# ----------------------------------------------------------------------------
def init_params(key, dim, num_heads):
    ks = jax.random.split(key, 14)
    s = 0.05
    return {
        "qkv0_w": s * jax.random.normal(ks[0], (dim, dim), jnp.float32),
        "qkv0_b": s * jax.random.normal(ks[1], (dim,), jnp.float32),
        "qkv1_w": s * jax.random.normal(ks[2], (dim, dim), jnp.float32),
        "qkv1_b": s * jax.random.normal(ks[3], (dim,), jnp.float32),
        "qkv2_w": s * jax.random.normal(ks[4], (dim, dim), jnp.float32),
        "qkv2_b": s * jax.random.normal(ks[5], (dim,), jnp.float32),
        "dw1_w": s * jax.random.normal(ks[6], (dim, 3, 3), jnp.float32),
        "dw1_b": s * jax.random.normal(ks[7], (dim,), jnp.float32),
        "dw2_w": s * jax.random.normal(ks[8], (dim, 3, 3), jnp.float32),
        "dw2_b": s * jax.random.normal(ks[9], (dim,), jnp.float32),
        "dw3_w": s * jax.random.normal(ks[10], (dim, 3, 3), jnp.float32),
        "dw3_b": s * jax.random.normal(ks[11], (dim,), jnp.float32),
        "proj_w": s * jax.random.normal(ks[12], (dim, dim), jnp.float32),
        "proj_b": s * jax.random.normal(ks[13], (dim,), jnp.float32),
        # nn.Parameter(torch.ones(num_heads, 1, 1)) -> per-head scalar
        "temperature": jnp.ones((num_heads,), jnp.float32),
    }


if __name__ == "__main__":
    dim, num_heads = 32, 4
    B, H, W = 2, 16, 16

    key = jax.random.PRNGKey(0)
    k_x, k_p = jax.random.split(key)
    x = jax.random.normal(k_x, (B, dim, H, W), jnp.float32)   # NCHW like PyTorch
    params = init_params(k_p, dim, num_heads)

    out = attention_forward(x, params, num_heads)
    out = jax.block_until_ready(out)
    assert out.shape == (B, dim, H, W)

    ref = reference_forward(x, params, num_heads)
    max_err = float(jnp.max(jnp.abs(out - ref)))
    assert max_err < 1e-2, f"mismatch vs reference: {max_err}"

    print("KERNEL_OK")
</pallas_src>

<mosaic_0001>
module attributes {stable_mosaic.version = 11 : i64} {
  func.func @_pw_kernel(%arg0: i32, %arg1: memref<256x32xf32, #tpu.memory_space<vmem>>, %arg2: memref<32x96xf32, #tpu.memory_space<vmem>>, %arg3: memref<1x96xf32, #tpu.memory_space<vmem>>, %arg4: memref<256x96xf32, #tpu.memory_space<vmem>>) attributes {dimension_semantics = [#tpu.dimension_semantics<parallel>], iteration_bounds = array<i64: 2>, scalar_prefetch = 0 : i64, scratch_operands = 0 : i64, tpu.core_type = #tpu.core_type<tc>, window_params = [{transform_indices = @transform_0, window_bounds = array<i64: 256, 32>}, {pipeline_mode = #tpu.pipeline_mode<synchronous>, transform_indices = @transform_1, window_bounds = array<i64: 32, 96>}, {pipeline_mode = #tpu.pipeline_mode<synchronous>, transform_indices = @transform_2, window_bounds = array<i64: 1, 96>}, {transform_indices = @transform_3, window_bounds = array<i64: 256, 96>}]} {
    %c0 = arith.constant 0 : index
    %c0_0 = arith.constant 0 : index
    %0 = vector.load %arg1[%c0, %c0_0] : memref<256x32xf32, #tpu.memory_space<vmem>>, vector<256x32xf32>
    %c0_1 = arith.constant 0 : index
    %c0_2 = arith.constant 0 : index
    %1 = vector.load %arg2[%c0_1, %c0_2] : memref<32x96xf32, #tpu.memory_space<vmem>>, vector<32x96xf32>
    %cst = arith.constant dense<0.000000e+00> : vector<256x96xf32>
    %2 = tpu.matmul %0, %1, %cst {dimension_numbers = #tpu.dot_dimension_numbers<[1], [0], [0], [1], [0, 0, 1, 1], [], []>} : vector<256x32xf32>, vector<32x96xf32>, vector<256x96xf32> -> vector<256x96xf32>
    %c0_3 = arith.constant 0 : index
    %c0_4 = arith.constant 0 : index
    %3 = vector.load %arg3[%c0_3, %c0_4] : memref<1x96xf32, #tpu.memory_space<vmem>>, vector<1x96xf32>
    %4 = vector.broadcast %3 : vector<1x96xf32> to vector<256x96xf32>
    %5 = arith.addf %2, %4 : vector<256x96xf32>
    %c0_5 = arith.constant 0 : index
    %c0_6 = arith.constant 0 : index
    %6 = vector.load %arg4[%c0_5, %c0_6] : memref<256x96xf32, #tpu.memory_space<vmem>>, vector<256x96xf32>
    tpu.vector_store %arg4[%c0_5, %c0_6], %5 {strides = array<i32>} : memref<256x96xf32, #tpu.memory_space<vmem>>, vector<256x96xf32>,
    return
  }
  func.func @transform_0(%arg0: i32) -> (i32, i32) {
    %c0_i32 = arith.constant 0 : i32
    %c0_i32_0 = arith.constant 0 : i32
    return %arg0, %c0_i32 : i32, i32
  }
  func.func @transform_1(%arg0: i32) -> (i32, i32) {
    %c0_i32 = arith.constant 0 : i32
    %c0_i32_0 = arith.constant 0 : i32
    %c0_i32_1 = arith.constant 0 : i32
    return %c0_i32, %c0_i32_0 : i32, i32
  }
  func.func @transform_2(%arg0: i32) -> (i32, i32) {
    %c0_i32 = arith.constant 0 : i32
    %c0_i32_0 = arith.constant 0 : i32
    %c0_i32_1 = arith.constant 0 : i32
    return %c0_i32, %c0_i32_0 : i32, i32
  }
  func.func @transform_3(%arg0: i32) -> (i32, i32) {
    %c0_i32 = arith.constant 0 : i32
    %c0_i32_0 = arith.constant 0 : i32
    return %arg0, %c0_i32 : i32, i32
  }
}

</mosaic_0001>

<bundles_post_ra>
// kernel: tpu_custom_call.1
= control target key start
LH: loop header
LB: loop body
LE: loop exit
PB: predicated region body
PF: predicated region fallthrough
CT: control target
= control target key end

     0   :  { %s812_s12 = smov 0   ;;  %s1017_s0 = inlined_call_operand.vmem [shape: f32[512,32], index: 0, kind: input, shape index: {}]   ;;  %s1018_s1 = inlined_call_operand.vmem [shape: f32[32,96], index: 1, kind: input, shape index: {}]   ;;  %s1019_s2 = inlined_call_operand.vmem [shape: f32[1,96], index: 2, kind: input, shape index: {}]   ;;  %s1020_s3 = inlined_call_operand.vmem [shape: f32[512,96], index: 3, kind: output, shape index: {}]  }
   0x1 LB: > { %s628_s13 = sadd.s32 4294967295, %s790_s12   ;;  %p632_p0 = scmp.ge.s32.totalorder %s790_s12, 1  ;;  %s790_s12 = sphi %s812_s12, %s13_s12  }
   0x2   : > { %p138_p1 = scmp.lt.s32.totalorder %s790_s12, 3 }
   0x4   : > { %p139_p2 = pnand %p632_p0, %p138_p1 }
   0x5   : > { %v206_v0 = vld [vmem:[%s1018_s1] sm:$0xff] (!%p139_p2)  ;;  %v207_v1 = vld [vmem:[%s1018_s1 + $0x8] sm:$0xff] (!%p139_p2)  ;;  %v208_v2 = vld [vmem:[%s1018_s1 + $0x10] sm:$0xff] (!%p139_p2)  ;;  %s633_s20 = sshll.u32 (!%p139_p2), %s628_s13, 5  ;;  %vm217_vm0 = vcmask (!%p139_p2), 261120   ;;  %vm539_vm1 = vcmask (!%p139_p2), 785408  }
   0x6   : > { %142 = sbr.rel (%p139_p2) target bundleno = 263 (0x107), region = 32  ;;  %v764_v3 = vpack.c.bf16 (!%p139_p2), %v207_v1, %v206_v0  ;;  %v209_v4 = vld [vmem:[%s1018_s1 + $0x18] sm:$0xff] (!%p139_p2)  ;;  %p163_p3 = scmp.lt.s32.totalorder (!%p139_p2), %s633_s20, 63  ;;  %v909_v38 = vld [vmem:[%s1019_s2] ss:$0 sm:$0xff] (!%p139_p2) }
   0x7   : > { %v768_v5 = vpack.c.bf16 (!%p139_p2), %v209_v4, %v208_v2 }
   0x8   : > { %765 = vmatprep.subr.bf16.mxu0 (!%p139_p2), %v764_v3  ;;  %772 = vmatprep.subr.bf16.mxu1 (!%p139_p2), %v764_v3 }
   0x9   : > { %767 = vmatpush3.bf16.msra.mxu0 (!%p139_p2), %v764_v3  ;;  %774 = vmatpush3.bf16.msra.mxu1 (!%p139_p2), %v764_v3 }
   0xa   : > { %769 = vmatprep.subr.bf16.mxu0 (!%p139_p2), %v768_v5  ;;  %773 = vmatprep.subr.bf16.mxu1 (!%p139_p2), %v768_v5 }
   0xd   : > { %s1022_s20 = smov (!%p163_p3, %s633_s20), 63  ;;  %771 = vmatpush3.bf16.msra.mxu0 %v768_v5  ;;  %775 = vmatpush3.bf16.msra.mxu1 %v768_v5 }
   0xe   : > { %s634_s23 = sshll.u32 %s1022_s20, 3 }
   0xf   : > { %s840_s26 = scalar_lea.vmem %s1017_s0, %s634_s23  ;;  %s916_s4 = scalar_lea.vmem %s1020_s3, %s634_s23 }
  0x10   : > { %v174_v6 = vld [vmem:[%s840_s26] sm:$0xff]  ;;  %v175_v8 = vld [vmem:[%s840_s26 + $0x8] sm:$0xff]  ;;  %v176_v10 = vld [vmem:[%s840_s26 + $0x10] sm:$0xff] }
  0x11   : > { %v190_v7 = vld [vmem:[%s840_s26 + $0x80] sm:$0xff]  ;;  %v191_v9 = vld [vmem:[%s840_s26 + $0x88] sm:$0xff]  ;;  %716 = vmatprep.mubr.msk.f32.mxu0 %vm217_vm0, %v174_v6  ;;  %v192_v11 = vld [vmem:[%s840_s26 + $0x90] sm:$0xff] }
  0x12   : > { %740 = vmatprep.mubr.msk.f32.mxu1 %vm217_vm0, %v190_v7  ;;  %717 = vmatmul.mubr.msk.f32.vlgmr.msra.gmra.mrb[0].mxu0 %vm217_vm0, %v175_v8  ;;  %v177_v12 = vld [vmem:[%s840_s26 + $0x18] sm:$0xff]  ;;  %v178_v14 = vld [vmem:[%s840_s26 + $0x20] sm:$0xff]  ;;  %v179_v16 = vld [vmem:[%s840_s26 + $0x28] sm:$0xff] }
  0x13   : > { %741 = vmatmul.mubr.msk.f32.vlgmr.msra.gmra.mrb[0].mxu1 %vm217_vm0, %v191_v9  ;;  %719 = vmatprep.mubr.msk.f32.mxu0 %vm217_vm0, %v176_v10  ;;  %v193_v13 = vld [vmem:[%s840_s26 + $0x98] sm:$0xff]  ;;  %v194_v15 = vld [vmem:[%s840_s26 + $0xa0] sm:$0xff]  ;;  %v195_v17 = vld [vmem:[%s840_s26 + $0xa8] sm:$0xff] }
  0x14   : > { %743 = vmatprep.mubr.msk.f32.mxu1 %vm217_vm0, %v192_v11  ;;  %v180_v18 = vld [vmem:[%s840_s26 + $0x30] sm:$0xff]  ;;  %v181_v20 = vld [vmem:[%s840_s26 + $0x38] sm:$0xff]  ;;  %v182_v22 = vld [vmem:[%s840_s26 + $0x40] sm:$0xff] }
  0x15   : > { %v196_v19 = vld [vmem:[%s840_s26 + $0xb0] sm:$0xff]  ;;  %v197_v21 = vld [vmem:[%s840_s26 + $0xb8] sm:$0xff]  ;;  %v198_v23 = vld [vmem:[%s840_s26 + $0xc0] sm:$0xff] }
  0x16   : > { %720 = vmatmul.mubr.msk.f32.gmra.mrb[2].mxu0 %vm217_vm0, %v177_v12  ;;  %v183_v24 = vld [vmem:[%s840_s26 + $0x48] sm:$0xff]  ;;  %v184_v26 = vld [vmem:[%s840_s26 + $0x50] sm:$0xff]  ;;  %v185_v28 = vld [vmem:[%s840_s26 + $0x58] sm:$0xff] }
  0x17   : > { %744 = vmatmul.mubr.msk.f32.gmra.mrb[2].mxu1 %vm217_vm0, %v193_v13  ;;  %722 = vmatprep.mubr.msk.f32.mxu0 %vm217_vm0, %v178_v14  ;;  %v199_v25 = vld [vmem:[%s840_s26 + $0xc8] sm:$0xff]  ;;  %v200_v27 = vld [vmem:[%s840_s26 + $0xd0] sm:$0xff]  ;;  %v201_v29 = vld [vmem:[%s840_s26 + $0xd8] sm:$0xff] }
  0x18   : > { %746 = vmatprep.mubr.msk.f32.mxu1 %vm217_vm0, %v194_v15  ;;  %v186_v30 = vld [vmem:[%s840_s26 + $0x60] sm:$0xff]  ;;  %v187_v32 = vld [vmem:[%s840_s26 + $0x68] sm:$0xff]  ;;  %v188_v34 = vld [vmem:[%s840_s26 + $0x70] sm:$0xff] }
  0x19   : > { %v202_v31 = vld [vmem:[%s840_s26 + $0xe0] sm:$0xff]  ;;  %v203_v33 = vld [vmem:[%s840_s26 + $0xe8] sm:$0xff]  ;;  %v204_v35 = vld [vmem:[%s840_s26 + $0xf0] sm:$0xff] }
  0x1a   : > { %723 = vmatmul.mubr.msk.f32.gmra.mrb[4].mxu0 %vm217_vm0, %v179_v16  ;;  %v189_v36 = vld [vmem:[%s840_s26 + $0x78] sm:$0xff] }
  0x1b   : > { %747 = vmatmul.mubr.msk.f32.gmra.mrb[4].mxu1 %vm217_vm0, %v195_v17  ;;  %725 = vmatprep.mubr.msk.f32.mxu0 %vm217_vm0, %v180_v18  ;;  %v205_v37 = vld [vmem:[%s840_s26 + $0xf8] sm:$0xff] }
  0x1c   : > { %749 = vmatprep.mubr.msk.f32.mxu1 %vm217_vm0, %v196_v19 }
  0x1e   : > { %726 = vmatmul.mubr.msk.f32.gmra.mrb[6].mxu0 %vm217_vm0, %v181_v20 }
  0x1f   : > { %750 = vmatmul.mubr.msk.f32.gmra.mrb[6].mxu1 %vm217_vm0, %v197_v21  ;;  %728 = vmatprep.mubr.msk.f32.mxu0 %vm217_vm0, %v182_v22 }
  0x20   : > { %752 = vmatprep.mubr.msk.f32.mxu1 %vm217_vm0, %v198_v23 }
  0x22   : > { %729 = vmatmul.mubr.msk.f32.gmra.mrb[8].mxu0 %vm217_vm0, %v183_v24 }
  0x23   : > { %753 = vmatmul.mubr.msk.f32.gmra.mrb[8].mxu1 %vm217_vm0, %v199_v25  ;;  %731 = vmatprep.mubr.msk.f32.mxu0 %vm217_vm0, %v184_v26 }
  0x24   : > { %755 = vmatprep.mubr.msk.f32.mxu1 %vm217_vm0, %v200_v27 }
  0x26   : > { %732 = vmatmul.mubr.msk.f32.gmra.mrb[10].mxu0 %vm217_vm0, %v185_v28 }
  0x27   : > { %756 = vmatmul.mubr.msk.f32.gmra.mrb[10].mxu1 %vm217_vm0, %v201_v29  ;;  %734 = vmatprep.mubr.msk.f32.mxu0 %vm217_vm0, %v186_v30 }
  0x28   : > { %758 = vmatprep.mubr.msk.f32.mxu1 %vm217_vm0, %v202_v31 }
  0x2a   : > { %735 = vmatmul.mubr.msk.f32.gmra.mrb[12].mxu0 %vm217_vm0, %v187_v32 }
  0x2b   : > { %759 = vmatmul.mubr.msk.f32.gmra.mrb[12].mxu1 %vm217_vm0, %v203_v33  ;;  %737 = vmatprep.mubr.msk.f32.mxu0 %vm217_vm0, %v188_v34 }
  0x2c   : > { %761 = vmatprep.mubr.msk.f32.mxu1 %vm217_vm0, %v204_v35 }
  0x2e   : > { %738 = vmatmul.mubr.msk.f32.gmra.mrb[14].mxu0 %vm217_vm0, %v189_v36 }
  0x2f   : > { %762 = vmatmul.mubr.msk.f32.gmra.mrb[14].mxu1 %vm217_vm0, %v205_v37 }
  0xe5   : > { %v718_v39 = vpop.f32.mrb[0].mxu0 }
  0xe6   : > { %v742_v40 = vpop.f32.mrb[0].mxu1  ;;  %v386_v41 = vadd.f32 %v718_v39, %v909_v38  ;;  %v380_v43 = vpop.f32.mrb[1].mxu0 }
  0xe7   : > { %v466_v42 = vadd.f32 %v742_v40, %v909_v38  ;;  %v460_v44 = vpop.f32.mrb[1].mxu1  ;;  %v381_v45 = vadd.f32 %v909_v38, %v380_v43 }
  0xe8   : > { %v461_v46 = vadd.f32 %v909_v38, %v460_v44  ;;  %541 = vst.msk [vmem:[%s916_s4 + $0x8] sm:$0xff] %vm539_vm1, %v386_v41 }
  0xe9   : > { %557 = vst.msk [vmem:[%s916_s4 + $0x88] sm:$0xff] %vm539_vm1, %v466_v42  ;;  %540 = vst.msk [vmem:[%s916_s4] sm:$0xff] %vm539_vm1, %v381_v45  ;;  %v721_v47 = vpop.f32.mrb[2].mxu0 }
  0xea   : > { %556 = vst.msk [vmem:[%s916_s4 + $0x80] sm:$0xff] %vm539_vm1, %v461_v46  ;;  %v745_v48 = vpop.f32.mrb[2].mxu1  ;;  %v396_v49 = vadd.f32 %v721_v47, %v909_v38  ;;  %v390_v51 = vpop.f32.mrb[3].mxu0 }
  0xeb   : > { %v476_v50 = vadd.f32 %v745_v48, %v909_v38  ;;  %v470_v52 = vpop.f32.mrb[3].mxu1  ;;  %v391_v53 = vadd.f32 %v909_v38, %v390_v51 }
  0xec   : > { %v471_v54 = vadd.f32 %v909_v38, %v470_v52  ;;  %543 = vst.msk [vmem:[%s916_s4 + $0x18] sm:$0xff] %vm539_vm1, %v396_v49 }
  0xed   : > { %559 = vst.msk [vmem:[%s916_s4 + $0x98] sm:$0xff] %vm539_vm1, %v476_v50  ;;  %542 = vst.msk [vmem:[%s916_s4 + $0x10] sm:$0xff] %vm539_vm1, %v391_v53  ;;  %v724_v55 = vpop.f32.mrb[4].mxu0 }
  0xee   : > { %558 = vst.msk [vmem:[%s916_s4 + $0x90] sm:$0xff] %vm539_vm1, %v471_v54  ;;  %v748_v56 = vpop.f32.mrb[4].mxu1  ;;  %v406_v57 = vadd.f32 %v724_v55, %v909_v38  ;;  %v400_v59 = vpop.f32.mrb[5].mxu0 }
  0xef   : > { %v486_v58 = vadd.f32 %v748_v56, %v909_v38  ;;  %v480_v60 = vpop.f32.mrb[5].mxu1  ;;  %v401_v61 = vadd.f32 %v909_v38, %v400_v59 }
  0xf0   : > { %v481_v62 = vadd.f32 %v909_v38, %v480_v60  ;;  %545 = vst.msk [vmem:[%s916_s4 + $0x28] sm:$0xff] %vm539_vm1, %v406_v57 }
  0xf1   : > { %561 = vst.msk [vmem:[%s916_s4 + $0xa8] sm:$0xff] %vm539_vm1, %v486_v58  ;;  %544 = vst.msk [vmem:[%s916_s4 + $0x20] sm:$0xff] %vm539_vm1, %v401_v61  ;;  %v727_v63 = vpop.f32.mrb[6].mxu0 }
  0xf2   : > { %560 = vst.msk [vmem:[%s916_s4 + $0xa0] sm:$0xff] %vm539_vm1, %v481_v62  ;;  %v751_v0 = vpop.f32.mrb[6].mxu1  ;;  %v416_v1 = vadd.f32 %v727_v63, %v909_v38  ;;  %v410_v3 = vpop.f32.mrb[7].mxu0 }
  0xf3   : > { %v496_v2 = vadd.f32 %v751_v0, %v909_v38  ;;  %v490_v4 = vpop.f32.mrb[7].mxu1  ;;  %v411_v5 = vadd.f32 %v909_v38, %v410_v3 }
  0xf4   : > { %v491_v6 = vadd.f32 %v909_v38, %v490_v4  ;;  %547 = vst.msk [vmem:[%s916_s4 + $0x38] sm:$0xff] %vm539_vm1, %v416_v1 }
  0xf5   : > { %563 = vst.msk [vmem:[%s916_s4 + $0xb8] sm:$0xff] %vm539_vm1, %v496_v2  ;;  %546 = vst.msk [vmem:[%s916_s4 + $0x30] sm:$0xff] %vm539_vm1, %v411_v5  ;;  %v730_v7 = vpop.f32.mrb[8].mxu0 }
  0xf6   : > { %562 = vst.msk [vmem:[%s916_s4 + $0xb0] sm:$0xff] %vm539_vm1, %v491_v6  ;;  %v754_v8 = vpop.f32.mrb[8].mxu1  ;;  %v426_v9 = vadd.f32 %v730_v7, %v909_v38  ;;  %v420_v11 = vpop.f32.mrb[9].mxu0 }
  0xf7   : > { %v506_v10 = vadd.f32 %v754_v8, %v909_v38  ;;  %v500_v12 = vpop.f32.mrb[9].mxu1  ;;  %v421_v13 = vadd.f32 %v909_v38, %v420_v11 }
  0xf8   : > { %v501_v14 = vadd.f32 %v909_v38, %v500_v12  ;;  %549 = vst.msk [vmem:[%s916_s4 + $0x48] sm:$0xff] %vm539_vm1, %v426_v9 }
  0xf9   : > { %565 = vst.msk [vmem:[%s916_s4 + $0xc8] sm:$0xff] %vm539_vm1, %v506_v10  ;;  %548 = vst.msk [vmem:[%s916_s4 + $0x40] sm:$0xff] %vm539_vm1, %v421_v13  ;;  %v733_v15 = vpop.f32.mrb[10].mxu0 }
  0xfa   : > { %564 = vst.msk [vmem:[%s916_s4 + $0xc0] sm:$0xff] %vm539_vm1, %v501_v14  ;;  %v757_v16 = vpop.f32.mrb[10].mxu1  ;;  %v436_v17 = vadd.f32 %v733_v15, %v909_v38  ;;  %v430_v19 = vpop.f32.mrb[11].mxu0 }
  0xfb   : > { %v516_v18 = vadd.f32 %v757_v16, %v909_v38  ;;  %v510_v20 = vpop.f32.mrb[11].mxu1  ;;  %v431_v21 = vadd.f32 %v909_v38, %v430_v19 }
  0xfc   : > { %v511_v22 = vadd.f32 %v909_v38, %v510_v20  ;;  %551 = vst.msk [vmem:[%s916_s4 + $0x58] sm:$0xff] %vm539_vm1, %v436_v17 }
  0xfd   : > { %567 = vst.msk [vmem:[%s916_s4 + $0xd8] sm:$0xff] %vm539_vm1, %v516_v18  ;;  %550 = vst.msk [vmem:[%s916_s4 + $0x50] sm:$0xff] %vm539_vm1, %v431_v21  ;;  %v736_v23 = vpop.f32.mrb[12].mxu0 }
  0xfe   : > { %566 = vst.msk [vmem:[%s916_s4 + $0xd0] sm:$0xff] %vm539_vm1, %v511_v22  ;;  %v760_v24 = vpop.f32.mrb[12].mxu1  ;;  %v446_v25 = vadd.f32 %v736_v23, %v909_v38  ;;  %v440_v27 = vpop.f32.mrb[13].mxu0 }
  0xff   : > { %v526_v26 = vadd.f32 %v760_v24, %v909_v38  ;;  %v520_v28 = vpop.f32.mrb[13].mxu1  ;;  %v441_v29 = vadd.f32 %v909_v38, %v440_v27 }
 0x100   : > { %v521_v30 = vadd.f32 %v909_v38, %v520_v28  ;;  %553 = vst.msk [vmem:[%s916_s4 + $0x68] sm:$0xff] %vm539_vm1, %v446_v25 }
 0x101   : > { %569 = vst.msk [vmem:[%s916_s4 + $0xe8] sm:$0xff] %vm539_vm1, %v526_v26  ;;  %552 = vst.msk [vmem:[%s916_s4 + $0x60] sm:$0xff] %vm539_vm1, %v441_v29  ;;  %v739_v31 = vpop.f32.mrb[14].mxu0 }
 0x102   : > { %568 = vst.msk [vmem:[%s916_s4 + $0xe0] sm:$0xff] %vm539_vm1, %v521_v30  ;;  %v763_v32 = vpop.f32.mrb[14].mxu1  ;;  %v456_v33 = vadd.f32 %v739_v31, %v909_v38  ;;  %v450_v35 = vpop.f32.mrb[15].mxu0 }
 0x103   : > { %v536_v34 = vadd.f32 %v763_v32, %v909_v38  ;;  %v530_v36 = vpop.f32.mrb[15].mxu1  ;;  %v451_v37 = vadd.f32 %v909_v38, %v450_v35 }
 0x104   : > { %v531_v39 = vadd.f32 %v909_v38, %v530_v36  ;;  %555 = vst.msk [vmem:[%s916_s4 + $0x78] sm:$0xff] %vm539_vm1, %v456_v33 }
 0x105   : > { %571 = vst.msk [vmem:[%s916_s4 + $0xf8] sm:$0xff] %vm539_vm1, %v536_v34  ;;  %554 = vst.msk [vmem:[%s916_s4 + $0x70] sm:$0xff] %vm539_vm1, %v451_v37 }
 0x106   : > { %570 = vst.msk [vmem:[%s916_s4 + $0xf0] sm:$0xff] %vm539_vm1, %v531_v39 }
 0x107 PF: > { %s13_s12 = sadd.s32 1, %s790_s12  }
 0x108   : > { %p10_p4 = scmp.ge.s32.totalorder %s13_s12, 4  }
 0x10a   :  { %12 = sbr.rel (!%p10_p4) target bundleno = 1 (0x1), region = 62 }

</bundles_post_ra>
